<compile_context>
chip_gen: v7x
topology: tpu7x:2x2x1
jax: 0.10.0
libtpu: 0.0.40
codegen_flags: <defaults>
</compile_context>

<pallas_src>
import math

import jax
import jax.numpy as jnp
from jax.experimental import pallas as pl
from jax.experimental.pallas import tpu as pltpu


def _mha_body(q_ref, k_ref, v_ref,
              wq_ref, bq_ref, wk_ref, bk_ref, wv_ref, bv_ref,
              wo_ref, bo_ref, o_ref,
              kcache_ref, vcache_ref, acc_ref, bias_ref=None):
    """One (batch, q_block, head) grid step.

    Kernel-view shapes:
      bias_ref   : (1, tq, S)        additive mask bias (cdt), optional
      q_ref      : (1, tq, D)        cdt
      k_ref      : (1, S, D)         cdt  (only consumed at qi == 0)
      v_ref      : (1, S, D)         cdt  (only consumed at qi == 0)
      wq/wk/wv   : (heads, D, d_k)   cdt, VMEM-resident (constant index_map)
      bq/bk/bv   : (heads, 1, d_k)   f32
      wo_ref     : (heads, d_k, D)   cdt
      bo_ref     : (1, D)            f32
      o_ref      : (1, tq, D)
      kcache_ref : (heads, S, d_k)   cdt scratch  (per-head projected K)
      vcache_ref : (heads, S, d_k)   cdt scratch  (per-head projected V)
      acc_ref    : (tq, D)           f32 scratch accumulator across heads
    """
    qi = pl.program_id(1)
    h = pl.program_id(2)
    cdt = q_ref.dtype

    # ---- K/V projection for this (batch, head): only at the first q-block,
    #      cached in VMEM scratch and reused for all later q-blocks. ----------
    @pl.when(qi == 0)
    def _():
        k_in = k_ref[0]                                    # (S, D)
        v_in = v_ref[0]
        kh = jnp.dot(k_in, wk_ref[h],
                     preferred_element_type=jnp.float32) + bk_ref[h]
        vh = jnp.dot(v_in, wv_ref[h],
                     preferred_element_type=jnp.float32) + bv_ref[h]
        kcache_ref[h] = kh.astype(cdt)
        vcache_ref[h] = vh.astype(cdt)

    # ---- accumulator init: broadcast output bias at the first head ----------
    @pl.when(h == 0)
    def _():
        acc_ref[...] = jnp.broadcast_to(bo_ref[...], acc_ref.shape)

    # Q projection (1/sqrt(d_k) pre-folded into wq/bq host-side).
    qh = jnp.dot(q_ref[0], wq_ref[h],
                 preferred_element_type=jnp.float32) + bq_ref[h]   # (tq, d_k)

    # scores = q @ k^T: contract dim 1 of both operands, no transpose.
    s = jax.lax.dot_general(
        qh.astype(cdt), kcache_ref[h],
        dimension_numbers=(((1,), (1,)), ((), ())),
        preferred_element_type=jnp.float32)                        # (tq, S)
    if bias_ref is not None:
        s = s + bias_ref[0].astype(jnp.float32)       # additive masked_fill

    # Softmax in f32; normalization deferred until after the PV matmul so the
    # reciprocal multiply is (tq, d_k)-wide instead of (tq, S)-wide.
    m = jnp.max(s, axis=-1, keepdims=True)
    e = jnp.exp(s - m)
    l = jnp.sum(e, axis=-1, keepdims=True)
    pv = jnp.dot(e.astype(cdt), vcache_ref[h],
                 preferred_element_type=jnp.float32)               # (tq, d_k)
    attn = pv * pl.reciprocal(l, approx=True)

    # Fused head-concat + output projection: accumulate this head's slice of
    # the out-projection directly into the f32 accumulator.
    acc_ref[...] += jnp.dot(attn.astype(cdt), wo_ref[h],
                            preferred_element_type=jnp.float32)

    @pl.when(h == pl.num_programs(2) - 1)
    def _():
        o_ref[0] = acc_ref[...].astype(o_ref.dtype)


def _make_kernel(with_bias):
    if with_bias:
        def kernel(bias_ref, q_ref, k_ref, v_ref,
                   wq_ref, bq_ref, wk_ref, bk_ref, wv_ref, bv_ref,
                   wo_ref, bo_ref, o_ref, kc_ref, vc_ref, acc_ref):
            _mha_body(q_ref, k_ref, v_ref,
                      wq_ref, bq_ref, wk_ref, bk_ref, wv_ref, bv_ref,
                      wo_ref, bo_ref, o_ref, kc_ref, vc_ref, acc_ref,
                      bias_ref=bias_ref)
    else:
        def kernel(q_ref, k_ref, v_ref,
                   wq_ref, bq_ref, wk_ref, bk_ref, wv_ref, bv_ref,
                   wo_ref, bo_ref, o_ref, kc_ref, vc_ref, acc_ref):
            _mha_body(q_ref, k_ref, v_ref,
                      wq_ref, bq_ref, wk_ref, bk_ref, wv_ref, bv_ref,
                      wo_ref, bo_ref, o_ref, kc_ref, vc_ref, acc_ref,
                      bias_ref=None)
    return kernel


def _pick_vmem_limit():
    """Per-generation VMEM cap: ~48 MiB on v7x (64 MiB physical), 96 MiB on
    v5e/v6e (128 MiB physical)."""
    kind = ""
    try:
        kind = jax.devices()[0].device_kind.lower()
    except Exception:
        pass
    if ("v7" in kind) or ("7x" in kind):
        return 48 * 1024 * 1024
    return 96 * 1024 * 1024


def multi_head_attention(q, k, v, params, heads, mask=None, *,
                         block_q=None, compute_dtype=None,
                         vmem_limit_bytes=None):
    """q, k, v: (bs, S, d_model).  mask: optional 0/1 mask broadcastable to
    (bs, S, S).

    params = (wq, bq, wk, bk, wv, bv, wo, bo) in PyTorch nn.Linear layout:
    W has shape (out_features, in_features), y = x @ W.T + b.
    """
    bs, S, D = q.shape
    assert D % heads == 0, "d_model must be divisible by heads"
    d_k = D // heads

    out_dtype = q.dtype
    if compute_dtype is None:
        cdt = jnp.bfloat16 if q.dtype == jnp.float32 else q.dtype
    else:
        cdt = jnp.dtype(compute_dtype)

    wq, bq, wk, bk, wv, bv, wo, bo = params
    inv_sqrt_dk = 1.0 / math.sqrt(d_k)

    def split_in(w, b, scale=1.0):
        # (out, in) -> (in, out) -> (heads, in, d_k); fold optional scale.
        w_h = (w.T * scale).reshape(D, heads, d_k).transpose(1, 0, 2)
        b_h = (b * scale).reshape(heads, 1, d_k)
        return w_h.astype(cdt), b_h.astype(jnp.float32)

    wq_h, bq_h = split_in(wq, bq, inv_sqrt_dk)   # scale folded into Q proj
    wk_h, bk_h = split_in(wk, bk)
    wv_h, bv_h = split_in(wv, bv)
    wo_h = wo.T.reshape(heads, d_k, D).astype(cdt)   # (heads, d_k, D)
    bo_r = bo.reshape(1, D).astype(jnp.float32)

    # --- q-block size: big tiles for MXU/step-overhead amortization. ---------
    if block_q is None:
        block_q = S if S <= 512 else 512
        # v7x: keep at least 2 parallel (batch) x (q-block) work units if easy.
        if bs == 1 and block_q == S and S >= 256:
            block_q = max(128, (S // 2 // 128) * 128)
    block_q = min(block_q, S)
    n_q = pl.cdiv(S, block_q)

    qc = q.astype(cdt)
    kc = k.astype(cdt)
    vc = v.astype(cdt)

    # Resident-weight specs: constant index_map -> DMA'd once, stay in VMEM.
    w_in_spec = pl.BlockSpec((heads, D, d_k), lambda b, qi, h: (0, 0, 0))
    b_in_spec = pl.BlockSpec((heads, 1, d_k), lambda b, qi, h: (0, 0, 0))
    wo_spec = pl.BlockSpec((heads, d_k, D), lambda b, qi, h: (0, 0, 0))
    bo_spec = pl.BlockSpec((1, D), lambda b, qi, h: (0, 0))

    q_spec = pl.BlockSpec((1, block_q, D), lambda b, qi, h: (b, qi, 0))
    kv_spec = pl.BlockSpec((1, S, D), lambda b, qi, h: (b, 0, 0))
    out_spec = pl.BlockSpec((1, block_q, D), lambda b, qi, h: (b, qi, 0))

    args = [qc, kc, vc, wq_h, bq_h, wk_h, bk_h, wv_h, bv_h, wo_h, bo_r]
    in_specs = [q_spec, kv_spec, kv_spec,
                w_in_spec, b_in_spec, w_in_spec, b_in_spec,
                w_in_spec, b_in_spec, wo_spec, bo_spec]

    bias_bytes = 0
    if mask is not None:
        # Additive mask bias (0 = keep, -1e9 = masked), computed once host-side.
        mask = jnp.asarray(mask)
        if mask.ndim == 2:
            mask = mask[None]
        mbs = mask.shape[0]
        mask = jnp.broadcast_to(mask, (mbs, S, S))
        bias = jnp.where(mask == 0, jnp.float32(-1000000000.0),
                         jnp.float32(0.0)).astype(cdt)
        bias_b = (lambda b: 0) if mbs == 1 else (lambda b: b)
        bias_spec = pl.BlockSpec((1, block_q, S),
                                 lambda b, qi, h: (bias_b(b), qi, 0))
        args = [bias] + args
        in_specs = [bias_spec] + in_specs
        bias_bytes = mbs * S * S * jnp.dtype(cdt).itemsize

    if vmem_limit_bytes is None:
        vmem_limit_bytes = _pick_vmem_limit()

    itemsize = jnp.dtype(cdt).itemsize
    cost = pl.CostEstimate(
        flops=int(bs * (8 * S * D * D + 4 * S * S * D)),
        transcendentals=int(bs * heads * S * S),
        bytes_accessed=int(itemsize * (4 * bs * S * D + 4 * D * D)
                           + bias_bytes + 4 * 4 * D),
    )

    return pl.pallas_call(
        _make_kernel(mask is not None),
        out_shape=jax.ShapeDtypeStruct((bs, S, D), out_dtype),
        grid_spec=pltpu.PrefetchScalarGridSpec(
            num_scalar_prefetch=0,
            grid=(bs, n_q, heads),
            in_specs=in_specs,
            out_specs=out_spec,
            scratch_shapes=[
                pltpu.VMEM((heads, S, d_k), cdt),     # cached projected K
                pltpu.VMEM((heads, S, d_k), cdt),     # cached projected V
                pltpu.VMEM((block_q, D), jnp.float32),  # head accumulator
            ],
        ),
        # Only the batch axis is parallel: the q-block axis carries the cached
        # K/V projections and the head axis carries the output accumulator.
        compiler_params=pltpu.CompilerParams(
            dimension_semantics=("parallel", "arbitrary", "arbitrary"),
            vmem_limit_bytes=int(vmem_limit_bytes),
        ),
        cost_estimate=cost,
    )(*args)


def _reference(q, k, v, params, heads, mask=None):
    """Plain-JAX reference mirroring the PyTorch forward (eval mode)."""
    bs, S, D = q.shape
    d_k = D // heads
    wq, bq, wk, bk, wv, bv, wo, bo = params

    def lin(x, w, b):
        return x @ w.T + b

    qp = lin(q, wq, bq).reshape(bs, S, heads, d_k).transpose(0, 2, 1, 3)
    kp = lin(k, wk, bk).reshape(bs, S, heads, d_k).transpose(0, 2, 1, 3)
    vp = lin(v, wv, bv).reshape(bs, S, heads, d_k).transpose(0, 2, 1, 3)

    scores = jnp.einsum('bhqd,bhkd->bhqk', qp, kp) / math.sqrt(d_k)
    if mask is not None:
        scores = jnp.where(mask[:, None, :, :] == 0, -1000000000.0, scores)
    scores = jax.nn.softmax(scores, axis=-1)
    out = jnp.einsum('bhqk,bhkd->bhqd', scores, vp)
    concat = out.transpose(0, 2, 1, 3).reshape(bs, S, D)
    return lin(concat, wo, bo)


if __name__ == "__main__":
    bs, S, d_model, heads = 2, 8, 32, 4

    key = jax.random.PRNGKey(0)
    keys = jax.random.split(key, 16)
    scale = 1.0 / math.sqrt(d_model)

    # Deterministic parameter init (PyTorch nn.Linear shapes: W (out,in), b (out,)).
    wq = jax.random.uniform(keys[0], (d_model, d_model), jnp.float32, -scale, scale)
    bq = jax.random.uniform(keys[1], (d_model,), jnp.float32, -scale, scale)
    wk = jax.random.uniform(keys[2], (d_model, d_model), jnp.float32, -scale, scale)
    bk = jax.random.uniform(keys[3], (d_model,), jnp.float32, -scale, scale)
    wv = jax.random.uniform(keys[4], (d_model, d_model), jnp.float32, -scale, scale)
    bv = jax.random.uniform(keys[5], (d_model,), jnp.float32, -scale, scale)
    wo = jax.random.uniform(keys[6], (d_model, d_model), jnp.float32, -scale, scale)
    bo = jax.random.uniform(keys[7], (d_model,), jnp.float32, -scale, scale)
    params = (wq, bq, wk, bk, wv, bv, wo, bo)

    q = jax.random.normal(keys[8], (bs, S, d_model), jnp.float32)
    k = jax.random.normal(keys[9], (bs, S, d_model), jnp.float32)
    v = jax.random.normal(keys[10], (bs, S, d_model), jnp.float32)

    # Causal-style 0/1 mask to exercise the masked_fill path.
    mask = jnp.tril(jnp.ones((S, S), jnp.float32))[None].repeat(bs, axis=0)

    ref = _reference(q, k, v, params, heads, mask=mask)

    # 1) f32 MXU operands, masked (tight tolerance; only the EUP approximate
    #    reciprocal in the softmax denominator differs from the reference).
    out_f32 = jax.block_until_ready(
        multi_head_attention(q, k, v, params, heads, mask=mask,
                             compute_dtype=jnp.float32))
    assert out_f32.shape == (bs, S, d_model)
    assert jnp.allclose(out_f32, ref, atol=1e-2, rtol=1e-2), "f32 mismatch"

    # 2) default (bf16 MXU operands, f32 accumulation/softmax), masked.
    out_bf16 = jax.block_until_ready(
        multi_head_attention(q, k, v, params, heads, mask=mask))
    assert jnp.allclose(out_bf16, ref, atol=1e-1, rtol=5e-2), "bf16 mismatch"

    # 3) specialized unmasked kernel (no bias input / no bias add).
    ref_nm = _reference(q, k, v, params, heads, mask=None)
    out_nm = jax.block_until_ready(
        multi_head_attention(q, k, v, params, heads, mask=None,
                             compute_dtype=jnp.float32))
    assert jnp.allclose(out_nm, ref_nm, atol=1e-2, rtol=1e-2), "no-mask mismatch"

    # 4) multi q-block path (n_q = 2) to exercise the cached K/V reuse across
    #    q-blocks within a batch.
    S2 = 16
    q2 = jax.random.normal(keys[11], (bs, S2, d_model), jnp.float32)
    k2 = jax.random.normal(keys[12], (bs, S2, d_model), jnp.float32)
    v2 = jax.random.normal(keys[13], (bs, S2, d_model), jnp.float32)
    mask2 = jnp.tril(jnp.ones((S2, S2), jnp.float32))[None].repeat(bs, axis=0)
    ref2 = _reference(q2, k2, v2, params, heads, mask=mask2)
    out2 = jax.block_until_ready(
        multi_head_attention(q2, k2, v2, params, heads, mask=mask2,
                             block_q=8, compute_dtype=jnp.float32))
    assert jnp.allclose(out2, ref2, atol=1e-2, rtol=1e-2), "multi-block mismatch"

    print("KERNEL_OK")
</pallas_src>

<mosaic_0001>
module attributes {stable_mosaic.version = 11 : i64} {
  func.func @kernel(%arg0: i32, %arg1: i32, %arg2: i32, %arg3: memref<1x8x8xf32, #tpu.memory_space<vmem>>, %arg4: memref<1x8x32xf32, #tpu.memory_space<vmem>>, %arg5: memref<1x8x32xf32, #tpu.memory_space<vmem>>, %arg6: memref<1x8x32xf32, #tpu.memory_space<vmem>>, %arg7: memref<4x32x8xf32, #tpu.memory_space<vmem>>, %arg8: memref<4x1x8xf32, #tpu.memory_space<vmem>>, %arg9: memref<4x32x8xf32, #tpu.memory_space<vmem>>, %arg10: memref<4x1x8xf32, #tpu.memory_space<vmem>>, %arg11: memref<4x32x8xf32, #tpu.memory_space<vmem>>, %arg12: memref<4x1x8xf32, #tpu.memory_space<vmem>>, %arg13: memref<4x8x32xf32, #tpu.memory_space<vmem>>, %arg14: memref<1x32xf32, #tpu.memory_space<vmem>>, %arg15: memref<1x8x32xf32, #tpu.memory_space<vmem>>, %arg16: memref<4x8x8xf32, #tpu.memory_space<vmem>>, %arg17: memref<4x8x8xf32, #tpu.memory_space<vmem>>, %arg18: memref<8x32xf32, #tpu.memory_space<vmem>>) attributes {dimension_semantics = [#tpu.dimension_semantics<parallel>, #tpu.dimension_semantics<arbitrary>, #tpu.dimension_semantics<arbitrary>], iteration_bounds = array<i64: 2, 1, 4>, scalar_prefetch = 0 : i64, scratch_operands = 3 : i64, tpu.core_type = #tpu.core_type<tc>, window_params = [{transform_indices = @transform_0, window_bounds = array<i64: 1, 8, 8>}, {transform_indices = @transform_1, window_bounds = array<i64: 1, 8, 32>}, {transform_indices = @transform_2, window_bounds = array<i64: 1, 8, 32>}, {transform_indices = @transform_3, window_bounds = array<i64: 1, 8, 32>}, {pipeline_mode = #tpu.pipeline_mode<synchronous>, transform_indices = @transform_4, window_bounds = array<i64: 4, 32, 8>}, {pipeline_mode = #tpu.pipeline_mode<synchronous>, transform_indices = @transform_5, window_bounds = array<i64: 4, 1, 8>}, {pipeline_mode = #tpu.pipeline_mode<synchronous>, transform_indices = @transform_6, window_bounds = array<i64: 4, 32, 8>}, {pipeline_mode = #tpu.pipeline_mode<synchronous>, transform_indices = @transform_7, window_bounds = array<i64: 4, 1, 8>}, {pipeline_mode = #tpu.pipeline_mode<synchronous>, transform_indices = @transform_8, window_bounds = array<i64: 4, 32, 8>}, {pipeline_mode = #tpu.pipeline_mode<synchronous>, transform_indices = @transform_9, window_bounds = array<i64: 4, 1, 8>}, {pipeline_mode = #tpu.pipeline_mode<synchronous>, transform_indices = @transform_10, window_bounds = array<i64: 4, 8, 32>}, {pipeline_mode = #tpu.pipeline_mode<synchronous>, transform_indices = @transform_11, window_bounds = array<i64: 1, 32>}, {transform_indices = @transform_12, window_bounds = array<i64: 1, 8, 32>}]} {
    %c0_i32 = arith.constant 0 : i32
    %0 = arith.cmpi eq, %arg1, %c0_i32 : i32
    %1 = arith.extui %0 : i1 to i32
    %c0_i32_0 = arith.constant 0 : i32
    %2 = arith.cmpi ne, %1, %c0_i32_0 : i32
    scf.if %2 {
      %c0_28 = arith.constant 0 : index
      %c0_29 = arith.constant 0 : index
      %c0_30 = arith.constant 0 : index
      %48 = vector.load %arg5[%c0_28, %c0_29, %c0_30] : memref<1x8x32xf32, #tpu.memory_space<vmem>>, vector<1x8x32xf32>
      %49 = vector.shape_cast %48 : vector<1x8x32xf32> to vector<8x32xf32>
      %c0_31 = arith.constant 0 : index
      %c0_32 = arith.constant 0 : index
      %c0_33 = arith.constant 0 : index
      %50 = vector.load %arg6[%c0_31, %c0_32, %c0_33] : memref<1x8x32xf32, #tpu.memory_space<vmem>>, vector<1x8x32xf32>
      %51 = vector.shape_cast %50 : vector<1x8x32xf32> to vector<8x32xf32>
      %52 = arith.index_cast %arg2 : i32 to index
      %c0_34 = arith.constant 0 : index
      %c0_35 = arith.constant 0 : index
      %53 = vector.load %arg9[%52, %c0_34, %c0_35] : memref<4x32x8xf32, #tpu.memory_space<vmem>>, vector<1x32x8xf32>
      %54 = vector.shape_cast %53 : vector<1x32x8xf32> to vector<32x8xf32>
      %cst_36 = arith.constant dense<0.000000e+00> : vector<8x8xf32>
      %55 = tpu.matmul %49, %54, %cst_36 {dimension_numbers = #tpu.dot_dimension_numbers<[1], [0], [0], [1], [0, 0, 1, 1], [], []>} : vector<8x32xf32>, vector<32x8xf32>, vector<8x8xf32> -> vector<8x8xf32>
      %56 = arith.index_cast %arg2 : i32 to index
      %c0_37 = arith.constant 0 : index
      %c0_38 = arith.constant 0 : index
      %57 = vector.load %arg10[%56, %c0_37, %c0_38] : memref<4x1x8xf32, #tpu.memory_space<vmem>>, vector<1x1x8xf32>
      %58 = vector.shape_cast %57 : vector<1x1x8xf32> to vector<1x8xf32>
      %59 = vector.broadcast %58 : vector<1x8xf32> to vector<8x8xf32>
      %60 = arith.addf %55, %59 : vector<8x8xf32>
      %61 = arith.index_cast %arg2 : i32 to index
      %c0_39 = arith.constant 0 : index
      %c0_40 = arith.constant 0 : index
      %62 = vector.load %arg11[%61, %c0_39, %c0_40] : memref<4x32x8xf32, #tpu.memory_space<vmem>>, vector<1x32x8xf32>
      %63 = vector.shape_cast %62 : vector<1x32x8xf32> to vector<32x8xf32>
      %cst_41 = arith.constant dense<0.000000e+00> : vector<8x8xf32>
      %64 = tpu.matmul %51, %63, %cst_41 {dimension_numbers = #tpu.dot_dimension_numbers<[1], [0], [0], [1], [0, 0, 1, 1], [], []>} : vector<8x32xf32>, vector<32x8xf32>, vector<8x8xf32> -> vector<8x8xf32>
      %65 = arith.index_cast %arg2 : i32 to index
      %c0_42 = arith.constant 0 : index
      %c0_43 = arith.constant 0 : index
      %66 = vector.load %arg12[%65, %c0_42, %c0_43] : memref<4x1x8xf32, #tpu.memory_space<vmem>>, vector<1x1x8xf32>
      %67 = vector.shape_cast %66 : vector<1x1x8xf32> to vector<1x8xf32>
      %68 = vector.broadcast %67 : vector<1x8xf32> to vector<8x8xf32>
      %69 = arith.addf %64, %68 : vector<8x8xf32>
      %70 = arith.index_cast %arg2 : i32 to index
      %c0_44 = arith.constant 0 : index
      %c0_45 = arith.constant 0 : index
      %71 = vector.load %arg16[%70, %c0_44, %c0_45] : memref<4x8x8xf32, #tpu.memory_space<vmem>>, vector<1x8x8xf32>
      %72 = vector.shape_cast %71 : vector<1x8x8xf32> to vector<8x8xf32>
      %73 = vector.shape_cast %60 : vector<8x8xf32> to vector<1x8x8xf32>
      tpu.vector_store %arg16[%70, %c0_44, %c0_45], %73 {strides = array<i32>} : memref<4x8x8xf32, #tpu.memory_space<vmem>>, vector<1x8x8xf32>,
      %74 = arith.index_cast %arg2 : i32 to index
      %c0_46 = arith.constant 0 : index
      %c0_47 = arith.constant 0 : index
      %75 = vector.load %arg17[%74, %c0_46, %c0_47] : memref<4x8x8xf32, #tpu.memory_space<vmem>>, vector<1x8x8xf32>
      %76 = vector.shape_cast %75 : vector<1x8x8xf32> to vector<8x8xf32>
      %77 = vector.shape_cast %69 : vector<8x8xf32> to vector<1x8x8xf32>
      tpu.vector_store %arg17[%74, %c0_46, %c0_47], %77 {strides = array<i32>} : memref<4x8x8xf32, #tpu.memory_space<vmem>>, vector<1x8x8xf32>,
    } else {
    }
    %c0_i32_1 = arith.constant 0 : i32
    %3 = arith.cmpi eq, %arg2, %c0_i32_1 : i32
    %4 = arith.extui %3 : i1 to i32
    %c0_i32_2 = arith.constant 0 : i32
    %5 = arith.cmpi ne, %4, %c0_i32_2 : i32
    scf.if %5 {
      %c0_28 = arith.constant 0 : index
      %c0_29 = arith.constant 0 : index
      %48 = vector.load %arg14[%c0_28, %c0_29] : memref<1x32xf32, #tpu.memory_space<vmem>>, vector<1x32xf32>
      %49 = vector.shape_cast %48 : vector<1x32xf32> to vector<1x32xf32>
      %50 = vector.broadcast %49 : vector<1x32xf32> to vector<8x32xf32>
      %c0_30 = arith.constant 0 : index
      %c0_31 = arith.constant 0 : index
      %51 = vector.load %arg18[%c0_30, %c0_31] : memref<8x32xf32, #tpu.memory_space<vmem>>, vector<8x32xf32>
      tpu.vector_store %arg18[%c0_30, %c0_31], %50 {strides = array<i32>} : memref<8x32xf32, #tpu.memory_space<vmem>>, vector<8x32xf32>,
    } else {
    }
    %c0 = arith.constant 0 : index
    %c0_3 = arith.constant 0 : index
    %c0_4 = arith.constant 0 : index
    %6 = vector.load %arg4[%c0, %c0_3, %c0_4] : memref<1x8x32xf32, #tpu.memory_space<vmem>>, vector<1x8x32xf32>
    %7 = vector.shape_cast %6 : vector<1x8x32xf32> to vector<8x32xf32>
    %8 = arith.index_cast %arg2 : i32 to index
    %c0_5 = arith.constant 0 : index
    %c0_6 = arith.constant 0 : index
    %9 = vector.load %arg7[%8, %c0_5, %c0_6] : memref<4x32x8xf32, #tpu.memory_space<vmem>>, vector<1x32x8xf32>
    %10 = vector.shape_cast %9 : vector<1x32x8xf32> to vector<32x8xf32>
    %cst = arith.constant dense<0.000000e+00> : vector<8x8xf32>
    %11 = tpu.matmul %7, %10, %cst {dimension_numbers = #tpu.dot_dimension_numbers<[1], [0], [0], [1], [0, 0, 1, 1], [], []>} : vector<8x32xf32>, vector<32x8xf32>, vector<8x8xf32> -> vector<8x8xf32>
    %12 = arith.index_cast %arg2 : i32 to index
    %c0_7 = arith.constant 0 : index
    %c0_8 = arith.constant 0 : index
    %13 = vector.load %arg8[%12, %c0_7, %c0_8] : memref<4x1x8xf32, #tpu.memory_space<vmem>>, vector<1x1x8xf32>
    %14 = vector.shape_cast %13 : vector<1x1x8xf32> to vector<1x8xf32>
    %15 = vector.broadcast %14 : vector<1x8xf32> to vector<8x8xf32>
    %16 = arith.addf %11, %15 : vector<8x8xf32>
    %17 = arith.index_cast %arg2 : i32 to index
    %c0_9 = arith.constant 0 : index
    %c0_10 = arith.constant 0 : index
    %18 = vector.load %arg16[%17, %c0_9, %c0_10] : memref<4x8x8xf32, #tpu.memory_space<vmem>>, vector<1x8x8xf32>
    %19 = vector.shape_cast %18 : vector<1x8x8xf32> to vector<8x8xf32>
    %cst_11 = arith.constant dense<0.000000e+00> : vector<8x8xf32>
    %20 = tpu.matmul %16, %19, %cst_11 {dimension_numbers = #tpu.dot_dimension_numbers<[1], [1], [0], [0], [0, 0, 1, 0], [], []>} : vector<8x8xf32>, vector<8x8xf32>, vector<8x8xf32> -> vector<8x8xf32>
    %c0_12 = arith.constant 0 : index
    %c0_13 = arith.constant 0 : index
    %c0_14 = arith.constant 0 : index
    %21 = vector.load %arg3[%c0_12, %c0_13, %c0_14] : memref<1x8x8xf32, #tpu.memory_space<vmem>>, vector<1x8x8xf32>
    %22 = vector.shape_cast %21 : vector<1x8x8xf32> to vector<8x8xf32>
    %23 = arith.addf %20, %22 : vector<8x8xf32>
    %cst_15 = arith.constant dense<0xFF800000> : vector<8xf32>
    %24 = vector.multi_reduction <maximumf>, %23, %cst_15 [1] : vector<8x8xf32> to vector<8xf32>
    %25 = vector.shape_cast %24 : vector<8xf32> to vector<8x1xf32>
    %26 = vector.broadcast %25 : vector<8x1xf32> to vector<8x8xf32>
    %27 = arith.subf %23, %26 : vector<8x8xf32>
    %28 = math.exp %27 : vector<8x8xf32>
    %cst_16 = arith.constant dense<0.000000e+00> : vector<8xf32>
    %29 = vector.multi_reduction <add>, %28, %cst_16 [1] : vector<8x8xf32> to vector<8xf32>
    %30 = vector.shape_cast %29 : vector<8xf32> to vector<8x1xf32>
    %31 = arith.index_cast %arg2 : i32 to index
    %c0_17 = arith.constant 0 : index
    %c0_18 = arith.constant 0 : index
    %32 = vector.load %arg17[%31, %c0_17, %c0_18] : memref<4x8x8xf32, #tpu.memory_space<vmem>>, vector<1x8x8xf32>
    %33 = vector.shape_cast %32 : vector<1x8x8xf32> to vector<8x8xf32>
    %cst_19 = arith.constant dense<0.000000e+00> : vector<8x8xf32>
    %34 = tpu.matmul %28, %33, %cst_19 {dimension_numbers = #tpu.dot_dimension_numbers<[1], [0], [0], [1], [0, 0, 1, 1], [], []>} : vector<8x8xf32>, vector<8x8xf32>, vector<8x8xf32> -> vector<8x8xf32>
    %35 = tpu.reciprocal %30 {approx = true} : vector<8x1xf32> -> vector<8x1xf32>
    %36 = vector.broadcast %35 : vector<8x1xf32> to vector<8x8xf32>
    %37 = arith.mulf %34, %36 : vector<8x8xf32>
    %c0_20 = arith.constant 0 : index
    %c0_21 = arith.constant 0 : index
    %38 = vector.load %arg18[%c0_20, %c0_21] : memref<8x32xf32, #tpu.memory_space<vmem>>, vector<8x32xf32>
    %39 = arith.index_cast %arg2 : i32 to index
    %c0_22 = arith.constant 0 : index
    %c0_23 = arith.constant 0 : index
    %40 = vector.load %arg13[%39, %c0_22, %c0_23] : memref<4x8x32xf32, #tpu.memory_space<vmem>>, vector<1x8x32xf32>
    %41 = vector.shape_cast %40 : vector<1x8x32xf32> to vector<8x32xf32>
    %cst_24 = arith.constant dense<0.000000e+00> : vector<8x32xf32>
    %42 = tpu.matmul %37, %41, %cst_24 {dimension_numbers = #tpu.dot_dimension_numbers<[1], [0], [0], [1], [0, 0, 1, 1], [], []>} : vector<8x8xf32>, vector<8x32xf32>, vector<8x32xf32> -> vector<8x32xf32>
    %43 = arith.addf %38, %42 : vector<8x32xf32>
    %c0_25 = arith.constant 0 : index
    %c0_26 = arith.constant 0 : index
    %44 = vector.load %arg18[%c0_25, %c0_26] : memref<8x32xf32, #tpu.memory_space<vmem>>, vector<8x32xf32>
    tpu.vector_store %arg18[%c0_25, %c0_26], %43 {strides = array<i32>} : memref<8x32xf32, #tpu.memory_space<vmem>>, vector<8x32xf32>,
    %c3_i32 = arith.constant 3 : i32
    %45 = arith.cmpi eq, %arg2, %c3_i32 : i32
    %46 = arith.extui %45 : i1 to i32
    %c0_i32_27 = arith.constant 0 : i32
    %47 = arith.cmpi ne, %46, %c0_i32_27 : i32
    scf.if %47 {
      %c0_28 = arith.constant 0 : index
      %c0_29 = arith.constant 0 : index
      %48 = vector.load %arg18[%c0_28, %c0_29] : memref<8x32xf32, #tpu.memory_space<vmem>>, vector<8x32xf32>
      %c0_30 = arith.constant 0 : index
      %c0_31 = arith.constant 0 : index
      %c0_32 = arith.constant 0 : index
      %49 = vector.load %arg15[%c0_30, %c0_31, %c0_32] : memref<1x8x32xf32, #tpu.memory_space<vmem>>, vector<1x8x32xf32>
      %50 = vector.shape_cast %49 : vector<1x8x32xf32> to vector<8x32xf32>
      %51 = vector.shape_cast %48 : vector<8x32xf32> to vector<1x8x32xf32>
      tpu.vector_store %arg15[%c0_30, %c0_31, %c0_32], %51 {strides = array<i32>} : memref<1x8x32xf32, #tpu.memory_space<vmem>>, vector<1x8x32xf32>,
    } else {
    }
    return
  }
  func.func @transform_0(%arg0: i32, %arg1: i32, %arg2: i32) -> (i32, i32, i32) {
    %c0_i32 = arith.constant 0 : i32
    %c0_i32_0 = arith.constant 0 : i32
    return %arg0, %arg1, %c0_i32 : i32, i32, i32
  }
  func.func @transform_1(%arg0: i32, %arg1: i32, %arg2: i32) -> (i32, i32, i32) {
    %c0_i32 = arith.constant 0 : i32
    %c0_i32_0 = arith.constant 0 : i32
    return %arg0, %arg1, %c0_i32 : i32, i32, i32
  }
  func.func @transform_2(%arg0: i32, %arg1: i32, %arg2: i32) -> (i32, i32, i32) {
    %c0_i32 = arith.constant 0 : i32
    %c0_i32_0 = arith.constant 0 : i32
    %c0_i32_1 = arith.constant 0 : i32
    return %arg0, %c0_i32, %c0_i32_0 : i32, i32, i32
  }
  func.func @transform_3(%arg0: i32, %arg1: i32, %arg2: i32) -> (i32, i32, i32) {
    %c0_i32 = arith.constant 0 : i32
    %c0_i32_0 = arith.constant 0 : i32
    %c0_i32_1 = arith.constant 0 : i32
    return %arg0, %c0_i32, %c0_i32_0 : i32, i32, i32
  }
  func.func @transform_4(%arg0: i32, %arg1: i32, %arg2: i32) -> (i32, i32, i32) {
    %c0_i32 = arith.constant 0 : i32
    %c0_i32_0 = arith.constant 0 : i32
    %c0_i32_1 = arith.constant 0 : i32
    %c0_i32_2 = arith.constant 0 : i32
    return %c0_i32, %c0_i32_0, %c0_i32_1 : i32, i32, i32
  }
  func.func @transform_5(%arg0: i32, %arg1: i32, %arg2: i32) -> (i32, i32, i32) {
    %c0_i32 = arith.constant 0 : i32
    %c0_i32_0 = arith.constant 0 : i32
    %c0_i32_1 = arith.constant 0 : i32
    %c0_i32_2 = arith.constant 0 : i32
    return %c0_i32, %c0_i32_0, %c0_i32_1 : i32, i32, i32
  }
  func.func @transform_6(%arg0: i32, %arg1: i32, %arg2: i32) -> (i32, i32, i32) {
    %c0_i32 = arith.constant 0 : i32
    %c0_i32_0 = arith.constant 0 : i32
    %c0_i32_1 = arith.constant 0 : i32
    %c0_i32_2 = arith.constant 0 : i32
    return %c0_i32, %c0_i32_0, %c0_i32_1 : i32, i32, i32
  }
  func.func @transform_7(%arg0: i32, %arg1: i32, %arg2: i32) -> (i32, i32, i32) {
    %c0_i32 = arith.constant 0 : i32
    %c0_i32_0 = arith.constant 0 : i32
    %c0_i32_1 = arith.constant 0 : i32
    %c0_i32_2 = arith.constant 0 : i32
    return %c0_i32, %c0_i32_0, %c0_i32_1 : i32, i32, i32
  }
  func.func @transform_8(%arg0: i32, %arg1: i32, %arg2: i32) -> (i32, i32, i32) {
    %c0_i32 = arith.constant 0 : i32
    %c0_i32_0 = arith.constant 0 : i32
    %c0_i32_1 = arith.constant 0 : i32
    %c0_i32_2 = arith.constant 0 : i32
    return %c0_i32, %c0_i32_0, %c0_i32_1 : i32, i32, i32
  }
  func.func @transform_9(%arg0: i32, %arg1: i32, %arg2: i32) -> (i32, i32, i32) {
    %c0_i32 = arith.constant 0 : i32
    %c0_i32_0 = arith.constant 0 : i32
    %c0_i32_1 = arith.constant 0 : i32
    %c0_i32_2 = arith.constant 0 : i32
    return %c0_i32, %c0_i32_0, %c0_i32_1 : i32, i32, i32
  }
  func.func @transform_10(%arg0: i32, %arg1: i32, %arg2: i32) -> (i32, i32, i32) {
    %c0_i32 = arith.constant 0 : i32
    %c0_i32_0 = arith.constant 0 : i32
    %c0_i32_1 = arith.constant 0 : i32
    %c0_i32_2 = arith.constant 0 : i32
    return %c0_i32, %c0_i32_0, %c0_i32_1 : i32, i32, i32
  }
  func.func @transform_11(%arg0: i32, %arg1: i32, %arg2: i32) -> (i32, i32) {
    %c0_i32 = arith.constant 0 : i32
    %c0_i32_0 = arith.constant 0 : i32
    %c0_i32_1 = arith.constant 0 : i32
    return %c0_i32, %c0_i32_0 : i32, i32
  }
  func.func @transform_12(%arg0: i32, %arg1: i32, %arg2: i32) -> (i32, i32, i32) {
    %c0_i32 = arith.constant 0 : i32
    %c0_i32_0 = arith.constant 0 : i32
    return %arg0, %arg1, %c0_i32 : i32, i32, i32
  }
}

</mosaic_0001>

<bundles_post_ra>
// kernel: tpu_custom_call.1
= control target key start
LH: loop header
LB: loop body
LE: loop exit
PB: predicated region body
PF: predicated region fallthrough
CT: control target
= control target key end

     0   :  { %s2961_s0 = inlined_call_operand.hbm [shape: f32[2,8,8], index: 0, kind: input, shape index: {}]   ;;  %s2962_s1 = inlined_call_operand.hbm [shape: f32[2,8,32], index: 1, kind: input, shape index: {}]   ;;  %s2963_s2 = inlined_call_operand.hbm [shape: f32[2,8,32], index: 2, kind: input, shape index: {}]   ;;  %s2964_s3 = inlined_call_operand.hbm [shape: f32[2,8,32], index: 3, kind: input, shape index: {}]   ;;  %s2965_s4 = inlined_call_operand.hbm [shape: f32[4,32,8], index: 4, kind: input, shape index: {}]   ;;  %s2966_s5 = inlined_call_operand.hbm [shape: f32[4,1,8], index: 5, kind: input, shape index: {}]   ;;  %s2967_s6 = inlined_call_operand.hbm [shape: f32[4,32,8], index: 6, kind: input, shape index: {}]   ;;  %s2968_s7 = inlined_call_operand.hbm [shape: f32[4,1,8], index: 7, kind: input, shape index: {}]   ;;  %s2969_s8 = inlined_call_operand.hbm [shape: f32[4,32,8], index: 8, kind: input, shape index: {}]   ;;  %s2970_s9 = inlined_call_operand.hbm [shape: f32[4,1,8], index: 9, kind: input, shape index: {}]   ;;  %s2971_s10 = inlined_call_operand.hbm [shape: f32[4,8,32], index: 10, kind: input, shape index: {}]   ;;  %s2972_s11 = inlined_call_operand.hbm [shape: f32[1,32], index: 11, kind: input, shape index: {}]   ;;  %s2973_s12 = inlined_call_operand.hbm [shape: f32[2,8,32], index: 12, kind: output, shape index: {}]  }
   0x1   :  { %3003 = sst [smem:[#allocation44_spill]] %s2961_s0 }
   0x2   :  { %3004 = sst [smem:[#allocation45_spill]] %s2962_s1 }
   0x3   :  { %3005 = sst [smem:[#allocation46_spill]] %s2963_s2 }
   0x4   :  { %3006 = sst [smem:[#allocation47_spill]] %s2964_s3 }
   0x5   :  { %3007 = sst [smem:[#allocation48_spill]] %s2965_s4 }
   0x6   :  { %3008 = sst [smem:[#allocation49_spill]] %s2966_s5 }
   0x7   :  { %3009 = sst [smem:[#allocation50_spill]] %s2967_s6 }
   0x8   :  { %3010 = sst [smem:[#allocation51_spill]] %s2968_s7 }
   0x9   :  { %3011 = sst [smem:[#allocation52_spill]] %s2970_s9 }
   0xa   :  { %3012 = sst [smem:[#allocation53_spill]] %s2973_s12 }
   0xb   :  { %17 = vsyncpa [#allocation6], 0 }
   0xc   :  { %19 = vsyncpa [#allocation6 + $0x1], 0 }
   0xd   :  { %20 = vsyncpa [#allocation9], 0 }
   0xe   :  { %22 = vsyncpa [#allocation9 + $0x1], 0 }
   0xf   :  { %23 = vsyncpa [#allocation12], 0 }
  0x10   :  { %25 = vsyncpa [#allocation12 + $0x1], 0 }
  0x11   :  { %26 = vsyncpa [#allocation15], 0 }
  0x12   :  { %27 = vsyncpa [#allocation18], 0 }
  0x13   :  { %28 = vsyncpa [#allocation21], 0 }
  0x14   :  { %29 = vsyncpa [#allocation24], 0 }
  0x15   :  { %30 = vsyncpa [#allocation7], 0 }
  0x16   :  { %32 = vsyncpa [#allocation7 + $0x1], 0  ;;  %s2364_s21 = smov 0   ;;  %s2366_s22 = smov 0  }
  0x17   :  { %s2368_s23 = smov 0   ;;  %s2370_s24 = smov 0  }
  0x18   :  { %s2372_s25 = smov 0   ;;  %s2374_s26 = smov 0  }
  0x19   :  { %s2376_s27 = smov 0   ;;  %s2378_s28 = smov 0  }
  0x1a LB: > { %3013 = sst [smem:[#allocation35_spill]] %s2261_s24  ;;  %s2405_s29 = sadd.s32 4294967295, %s2277_s28   ;;  %s2277_s28 = sphi %s2378_s28, %s38_s28   ;;  %s2273_s27 = sphi %s2376_s27, %s3076_s27   ;;  %s2269_s26 = sphi %s2374_s26, %s3075_s26   ;;  %s2265_s25 = sphi %s2372_s25, %s3074_s25   ;;  %s2261_s24 = sphi %s2370_s24, %s3073_s24   ;;  %s2257_s23 = sphi %s2368_s23, %s3079_s23   ;;  %s2253_s22 = sphi %s2366_s22, %s3078_s22   ;;  %s2249_s21 = sphi %s2364_s21, %s3077_s21  }
  0x1b   : > { %3014 = sst [smem:[#allocation36_spill]] %s2265_s25  ;;  %p1482_p0 = scmp.ge.s32.totalorder %s2277_s28, 1 }
  0x1c   : > { %3015 = sst [smem:[#allocation37_spill]] %s2269_s26  ;;  %p2977_p1 = scmp.eq.s32.totalorder %s2405_s29, 0 }
  0x1d   : > { %3016 = sst [smem:[#allocation38_spill]] %s2273_s27  ;;  %p366_p2 = scmp.lt.s32.totalorder %s2277_s28, 9 }
  0x1e   : > { %s2279_s13 = smov [#allocation13]   ;;  %s2280_s16 = smov [#allocation14]  }
  0x1f   : > { %p2410_p3 = pnand %p1482_p0, %p366_p2  ;;  %s378_s14 = sshll.u32 %s2279_s13, 4  ;;  %s379_s14 = int_to_ptr.vmem [resolvable:$true] %s378_s14 }
  0x20   : > { %s391_s17 = sshll.u32 %s2280_s16, 4  ;;  %s3020_s4 = sld [smem:[#allocation48_spill]]  ;;  %s2422_s17 = int_to_ptr.vmem [resolvable:$true] %s391_s17 }
  0x21   : > { %s3017_s30 = scalar_select %p2410_p3, 1, 0 }
  0x22   : > { %p1664_p4 = pneg %p2410_p3 }
  0x23   : > { %3018 = sst [smem:[#allocation39_spill]] %s3017_s30 }
  0x24   : > { %p2418_p5 = pnand %p1664_p4, %p2977_p1 }
  0x26   : > { %s3019_s15 = scalar_select %p2418_p5, 1, 0 }
  0x27   : > { %s1807_s20 = scalar_lea.hbm %s3020_s4, 2048  ;;  %p2432_p7 = pneg %p2418_p5 }
  0x28   : > { %p1808_p6 = scmp.ne.s32.totalorder %s3020_s4, %s1807_s20  ;;  %p1814_p10 = scmp.lt.u32.totalorder %s1807_s20, %s3020_s4 }
  0x29   : > { %s3021_s13 = scalar_select %p2432_p7, 1, 0 }
  0x2a   : > { %p1810_p8 = pnand %p2432_p7, %p1808_p6 }
  0x2c   : > { %p1811_p9 = pneg %p1810_p8 }
  0x2e   : > { %p1816_p11 = pnand %p1814_p10, %p1811_p9 }
  0x30   : > { %1819 = shalt.err (!%p1816_p11)
}
  0x31   : > { %s1820_s18 = scalar_lea.vmem %s379_s14, 2048  ;;  %p1828_p2 = scmp.lt.s32.totalorder %s379_s14, %s379_s14 }
  0x32   : > { %p1821_p12 = scmp.ne.s32.totalorder %s379_s14, %s1820_s18  ;;  %p1829_p4 = scmp.lt.s32.totalorder %s1820_s18, %s1820_s18 }
  0x34   : > { %p1823_p13 = pnand %p1821_p12, %p2432_p7  ;;  %p1830_p1 = por %p1829_p4, %p1828_p2 }
  0x36   : > { %p1824_p0 = pneg %p1823_p13 }
  0x38   : > { %p1831_p3 = pnand %p1830_p1, %p1824_p0 }
  0x3a   : > { %1834 = shalt.err (!%p1831_p3)
}
  0x3b   : > { %s2983_s12 = smov 128   ;;  %s2985_s25 = smov 8  }
  0x3c   : > { %1667 = dma.hbm_to_vmem [thread:$0]  (!%p2418_p5), %s3020_s4, 2048, %s379_s14, [#allocation12], %s2983_s12, %s2983_s12, %s2985_s25  }
  0x3d   : > { %s3022_s5 = sld [smem:[#allocation49_spill]] }
  0x43   : > { %s1835_s30 = scalar_lea.hbm %s3022_s5, 64 }
  0x44   : > { %p1836_p1 = scmp.ne.s32.totalorder %s3022_s5, %s1835_s30  ;;  %p1842_p8 = scmp.lt.u32.totalorder %s1835_s30, %s3022_s5 }
  0x46   : > { %p1838_p3 = pnand %p1836_p1, %p2432_p7 }
  0x48   : > { %p1839_p6 = pneg %p1838_p3 }
  0x4a   : > { %p1844_p9 = pnand %p1842_p8, %p1839_p6 }
  0x4c   : > { %1847 = shalt.err (!%p1844_p9)
}
  0x4d   : > { %s1848_s14 = scalar_lea.vmem %s2422_s17, 64  ;;  %p1856_p13 = scmp.lt.s32.totalorder %s2422_s17, %s2422_s17 }
  0x4e   : > { %p1849_p10 = scmp.ne.s32.totalorder %s2422_s17, %s1848_s14  ;;  %p1857_p0 = scmp.lt.s32.totalorder %s1848_s14, %s1848_s14 }
  0x50   : > { %p1851_p11 = pnand %p1849_p10, %p2432_p7  ;;  %p1858_p2 = por %p1857_p0, %p1856_p13 }
  0x52   : > { %p1852_p12 = pneg %p1851_p11 }
  0x54   : > { %p1859_p4 = pnand %p1858_p2, %p1852_p12 }
  0x56   : > { %1862 = shalt.err (!%p1859_p4)
}
  0x57   : > { %s2283_s3 = smov 16   ;;  %s2284_s0 = smov 1  }
  0x58   : > { %1670 = dma.hbm_to_vmem [thread:$0]  (!%p2418_p5), %s3022_s5, 64, %s2422_s17, [#allocation15], %s2283_s3, %s2283_s3, %s2284_s0  }
  0x59   : > { %s2285_s24 = smov [#allocation17]   ;;  %s2286_s20 = smov [#allocation20]  }
  0x5a   : > { %s417_s19 = sshll.u32 %s2285_s24, 4  ;;  %s443_s16 = sshll.u32 %s2286_s20, 4  ;;  %s418_s19 = int_to_ptr.vmem [resolvable:$true] %s417_s19  ;;  %s2477_s16 = int_to_ptr.vmem [resolvable:$true] %s443_s16 }
  0x5b   : > { %s3023_s7 = sld [smem:[#allocation51_spill]] }
  0x61   : > { %s1863_s12 = scalar_lea.hbm %s3023_s7, 64 }
  0x62   : > { %p1864_p1 = scmp.ne.s32.totalorder %s3023_s7, %s1863_s12  ;;  %p1870_p8 = scmp.lt.u32.totalorder %s1863_s12, %s3023_s7 }
  0x64   : > { %p1866_p3 = pnand %p1864_p1, %p2432_p7 }
  0x66   : > { %p1867_p6 = pneg %p1866_p3 }
  0x68   : > { %p1872_p9 = pnand %p1870_p8, %p1867_p6 }
  0x6a   : > { %1875 = shalt.err (!%p1872_p9)
}
  0x6b   : > { %s1876_s30 = scalar_lea.vmem %s418_s19, 64  ;;  %p1884_p13 = scmp.lt.s32.totalorder %s418_s19, %s418_s19 }
  0x6c   : > { %p1877_p10 = scmp.ne.s32.totalorder %s418_s19, %s1876_s30  ;;  %p1885_p0 = scmp.lt.s32.totalorder %s1876_s30, %s1876_s30 }
  0x6e   : > { %p1879_p11 = pnand %p1877_p10, %p2432_p7  ;;  %p1886_p2 = por %p1885_p0, %p1884_p13 }
  0x70   : > { %p1880_p12 = pneg %p1879_p11 }
  0x72   : > { %p1887_p4 = pnand %p1886_p2, %p1880_p12 }
  0x74   : > { %1890 = shalt.err (!%p1887_p4)
}
  0x75   : > { %1676 = dma.hbm_to_vmem [thread:$0]  (!%p2418_p5), %s3023_s7, 64, %s418_s19, [#allocation18], %s2283_s3, %s2283_s3, %s2284_s0  }
  0x76   : > { %s3024_s9 = sld [smem:[#allocation52_spill]] }
  0x7c   : > { %s1891_s20 = scalar_lea.hbm %s3024_s9, 64 }
  0x7d   : > { %p1892_p1 = scmp.ne.s32.totalorder %s3024_s9, %s1891_s20  ;;  %p1898_p8 = scmp.lt.u32.totalorder %s1891_s20, %s3024_s9 }
  0x7f   : > { %p1894_p3 = pnand %p1892_p1, %p2432_p7 }
  0x81   : > { %p1895_p6 = pneg %p1894_p3 }
  0x83   : > { %p1900_p9 = pnand %p1898_p8, %p1895_p6 }
  0x85   : > { %1903 = shalt.err (!%p1900_p9)
}
  0x86   : > { %s1904_s19 = scalar_lea.vmem %s2477_s16, 64  ;;  %p1912_p13 = scmp.lt.s32.totalorder %s2477_s16, %s2477_s16 }
  0x87   : > { %p1905_p10 = scmp.ne.s32.totalorder %s2477_s16, %s1904_s19  ;;  %p1913_p0 = scmp.lt.s32.totalorder %s1904_s19, %s1904_s19 }
  0x89   : > { %p1907_p11 = pnand %p1905_p10, %p2432_p7  ;;  %p1914_p2 = por %p1913_p0, %p1912_p13 }
  0x8b   : > { %p1908_p12 = pneg %p1907_p11 }
  0x8d   : > { %p1915_p4 = pnand %p1914_p2, %p1908_p12 }
  0x8f   : > { %1918 = shalt.err (!%p1915_p4)
}
  0x90   : > { %1682 = dma.hbm_to_vmem [thread:$0]  (!%p2418_p5), %s3024_s9, 64, %s2477_s16, [#allocation21], %s2283_s3, %s2283_s3, %s2284_s0  }
  0x91   : > { %s1481_s12 = sadd.s32 4294967294, %s2277_s28   ;;  %s50_s25 = sadd.s32 1, %s2269_s26 }
  0x92   : > { %p51_p1 = scmp.ge.s32.totalorder %s50_s25, 4  ;;  %s57_s24 = sadd.s32 1, %s2273_s27 }
  0x93   : > { %s66_s20 = sadd.s32 1, %s2257_s23  ;;  %p73_p3 = scmp.ne.s32.totalorder %s2257_s23, %s2253_s22 }
  0x94   : > { %s3081_s25 = smov (%p51_p1, %s50_s25), 0  ;;  %s3083_s24 = smov (!%p51_p1, %s57_s24), %s2273_s27 }
  0x95   : > { %3025 = sst [smem:[#allocation40_spill]] %s3081_s25  ;;  %p74_p6 = scmp.eq.s32.totalorder %s2277_s28, 0 }
  0x96   : > { %p79_p8 = scmp.ne.s32.totalorder %s2253_s22, %s2249_s21  ;;  %p59_p9 = scmp.ge.s32.totalorder %s3083_s24, 2 }
  0x97   : > { %p353_p10 = scmp.eq.s32.totalorder %s2405_s29, 7  ;;  %p2539_p11 = por %p74_p6, %p73_p3 }
  0x98   : > { %p3027_p12 = scmp.eq.s32.totalorder %s2405_s29, 0  ;;  %s3085_s24 = smov (%p59_p9, %s3083_s24), 0 }
  0x99   : > { %3029 = sst [smem:[#allocation41_spill]] %s3085_s24  ;;  %p2551_p0 = por %p353_p10, %p73_p3 }
  0x9a   : > { %p2545_p13 = por %p3027_p12, %p79_p8  ;;  %p359_p2 = scmp.eq.s32.totalorder %s1481_s12, 7 }
  0x9b   : > { %s3030_s16 = scalar_select %p2551_p0, 1, 0 }
  0x9c   : > { %s3028_s0 = scalar_select %p2545_p13, 1, 0 }
  0x9d   : > { %s61_s18 = ssub.s32 %s2273_s27, %s3085_s24  ;;  %p1714_p4 = scmp.lt.s32.totalorder %s2277_s28, 8 }
  0x9e   : > { %p64_p1 = scmp.eq.s32.totalorder %s61_s18, 0  ;;  %p2558_p6 = por %p359_p2, %p79_p8 }
  0x9f   : > { %s2987_s2 = sand.u32 1, %s2257_s23   ;;  %s2564_s17 = sshll.u32 %s2273_s27, 7 }
  0xa0   : > { %s3031_s14 = scalar_select %p2558_p6, 1, 0 }
  0xa1   : > { %s2567_s19 = scalar_select %p64_p1, %s2257_s23, %s66_s20  }
  0xa2   : > { %3032 = sst [smem:[#allocation42_spill]] %s3031_s14  ;;  %s2571_s30 = sshll.u32 %s2987_s2, 3 }
  0xa3   : > { %3033 = sst [smem:[#allocation43_spill]] %s2567_s19  ;;  %p2575_p3 = pnand %p1714_p4, %p2539_p11 }
  0xa4   : > { %s2991_s12 = sand.u32 1, %s2277_s28   ;;  %s3035_s1 = sld [smem:[#allocation45_spill]] }
  0xa5   : > { %s3034_s4 = scalar_select %p2575_p3, 1, 0 }
  0xa6   : > { %s504_s20 = scalar_lea.vmem [#allocation8], %s2571_s30  ;;  %s2591_s3 = scalar_lea.sflag [#allocation9], %s2991_s12 }
  0xa7   : > { %s512_s2 = sshll.u32 %s504_s20, 4  ;;  %p2597_p9 = pneg %p2575_p3  ;;  %s2587_s2 = int_to_ptr.vmem [resolvable:$true] %s512_s2 }
  0xa9   : > { %s3036_s24 = scalar_select %p2597_p9, 1, 0 }
  0xaa   : > { %s2584_s7 = scalar_lea.hbm %s3035_s1, %s2564_s17  ;;  %s1924_s20 = scalar_lea.hbm %s3035_s1, 256 }
  0xab   : > { %s1919_s9 = scalar_lea.hbm %s2584_s7, 128  ;;  %p1925_p12 = scmp.lt.u32.totalorder %s2584_s7, %s3035_s1 }
  0xac   : > { %p1920_p8 = scmp.ne.s32.totalorder %s2584_s7, %s1919_s9  ;;  %p1926_p2 = scmp.lt.u32.totalorder %s1924_s20, %s1919_s9 }
  0xad   : > { %p1928_p1 = scmp.lt.u32.totalorder %s1919_s9, %s2584_s7 }
  0xae   : > { %p1922_p10 = pnand %p2597_p9, %p1920_p8  ;;  %p1927_p4 = por %p1926_p2, %p1925_p12 }
  0xb0   : > { %p1923_p11 = pneg %p1922_p10  ;;  %p1929_p6 = por %p1928_p1, %p1927_p4 }
  0xb2   : > { %p1930_p0 = pnand %p1929_p6, %p1923_p11 }
  0xb4   : > { %1933 = shalt.err (!%p1930_p0)
}
  0xb5   : > { %s1934_s12 = scalar_lea.vmem %s2587_s2, 128  ;;  %s2287_s5 = smov [#allocation8]  }
  0xb6   : > { %p1935_p8 = scmp.ne.s32.totalorder %s2587_s2, %s1934_s12  ;;  %s1939_s18 = sshll.u32 %s2287_s5, 4  ;;  %s1940_s18 = int_to_ptr.vmem [resolvable:$false] %s1939_s18 }
  0xb7   : > { %s1941_s27 = scalar_lea.vmem %s1940_s18, 256  ;;  %p1942_p5 = scmp.lt.s32.totalorder %s2587_s2, %s1940_s18 }
  0xb8   : > { %p1937_p10 = pnand %p1935_p8, %p2597_p9  ;;  %p1943_p7 = scmp.lt.s32.totalorder %s1941_s27, %s1934_s12 }
  0xba   : > { %p1938_p13 = pneg %p1937_p10  ;;  %p1944_p12 = por %p1943_p7, %p1942_p5 }
  0xbc   : > { %p1945_p2 = pnand %p1944_p12, %p1938_p13 }
  0xbe   : > { %1948 = shalt.err (!%p1945_p2)
}
  0xbf   : > { %1695 = dma.hbm_to_vmem [thread:$0]  (!%p2575_p3), %s2584_s7, 128, %s2587_s2, %s2591_s3  }
  0xc0   : > { %s2288_s9 = smov [#allocation16]   ;;  %s2289_s20 = smov [#allocation19]  }
  0xc1   : > { %s404_s25 = sshll.u32 %s2288_s9, 4  ;;  %s430_s1 = sshll.u32 %s2289_s20, 4  ;;  %s405_s25 = int_to_ptr.vmem [resolvable:$true] %s404_s25  ;;  %s2621_s1 = int_to_ptr.vmem [resolvable:$true] %s430_s1 }
  0xc2   : > { %s3037_s6 = sld [smem:[#allocation50_spill]]  ;;  %p3038_p7 = scmp.ne.s32.totalorder %s3021_s13, 0 }
  0xc8   : > { %s1949_s12 = scalar_lea.hbm %s3037_s6, 2048 }
  0xc9   : > { %p1950_p5 = scmp.ne.s32.totalorder %s3037_s6, %s1949_s12  ;;  %p1956_p6 = scmp.lt.u32.totalorder %s1949_s12, %s3037_s6 }
  0xcb   : > { %p1952_p13 = pnand %p1950_p5, %p3038_p7 }
  0xcd   : > { %p1953_p0 = pneg %p1952_p13 }
  0xcf   : > { %p1958_p11 = pnand %p1956_p6, %p1953_p0 }
  0xd1   : > { %1961 = shalt.err (!%p1958_p11)
}
  0xd2   : > { %s1962_s2 = scalar_lea.vmem %s405_s25, 2048  ;;  %p1970_p10 = scmp.lt.s32.totalorder %s405_s25, %s405_s25 }
  0xd3   : > { %p1963_p4 = scmp.ne.s32.totalorder %s405_s25, %s1962_s2  ;;  %p1971_p12 = scmp.lt.s32.totalorder %s1962_s2, %s1962_s2 }
  0xd5   : > { %p1965_p1 = pnand %p1963_p4, %p3038_p7  ;;  %p1972_p2 = por %p1971_p12, %p1970_p10 }
  0xd7   : > { %p1966_p8 = pneg %p1965_p1 }
  0xd9   : > { %p1973_p3 = pnand %p1972_p2, %p1966_p8 }
  0xdb   : > { %1976 = shalt.err (!%p1973_p3)
}
  0xdc   : > { %p3039_p5 = scmp.ne.s32.totalorder %s3019_s15, 0  ;;  %s3040_s26 = smov 8  }
  0xdd   : > { %s3041_s9 = smov 128   ;;  %s1977_s12 = scalar_lea.hbm %s2969_s8, 2048 }
  0xde   : > { %1673 = dma.hbm_to_vmem [thread:$0]  (!%p3039_p5), %s3037_s6, 2048, %s405_s25, [#allocation15], %s3041_s9, %s3041_s9, %s3040_s26  }
  0xdf   : > { %p1978_p13 = scmp.ne.s32.totalorder %s2969_s8, %s1977_s12  ;;  %p1984_p6 = scmp.lt.u32.totalorder %s1977_s12, %s2969_s8 }
  0xe1   : > { %p1980_p3 = pnand %p1978_p13, %p3038_p7 }
  0xe3   : > { %p1981_p0 = pneg %p1980_p3 }
  0xe5   : > { %p1986_p11 = pnand %p1984_p6, %p1981_p0 }
  0xe7   : > { %1989 = shalt.err (!%p1986_p11)
}
  0xe8   : > { %s1990_s25 = scalar_lea.vmem %s2621_s1, 2048  ;;  %p1998_p10 = scmp.lt.s32.totalorder %s2621_s1, %s2621_s1 }
  0xe9   : > { %p1991_p4 = scmp.ne.s32.totalorder %s2621_s1, %s1990_s25  ;;  %p1999_p12 = scmp.lt.s32.totalorder %s1990_s25, %s1990_s25 }
  0xeb   : > { %p1993_p1 = pnand %p1991_p4, %p3038_p7  ;;  %p2000_p2 = por %p1999_p12, %p1998_p10 }
  0xed   : > { %p1994_p8 = pneg %p1993_p1 }
  0xef   : > { %p2001_p13 = pnand %p2000_p2, %p1994_p8 }
  0xf1   : > { %2004 = shalt.err (!%p2001_p13)
}
  0xf2   : > { %1679 = dma.hbm_to_vmem [thread:$0]  (!%p3039_p5), %s2969_s8, 2048, %s2621_s1, [#allocation18], %s3041_s9, %s3041_s9, %s3040_s26  }
  0xf3   : > { %s2290_s20 = smov [#allocation22]   ;;  %s2291_s18 = smov [#allocation23]  }
  0xf4   : > { %s456_s5 = sshll.u32 %s2290_s20, 4  ;;  %s470_s12 = sshll.u32 %s2291_s18, 4  ;;  %s457_s5 = int_to_ptr.vmem [resolvable:$true] %s456_s5  ;;  %s2670_s12 = int_to_ptr.vmem [resolvable:$true] %s470_s12 }
  0xf5   : > { %s2005_s2 = scalar_lea.hbm %s2971_s10, 512 }
  0xf6   : > { %p2006_p3 = scmp.ne.s32.totalorder %s2971_s10, %s2005_s2  ;;  %p2012_p11 = scmp.lt.u32.totalorder %s2005_s2, %s2971_s10 }
  0xf8   : > { %p2008_p0 = pnand %p2006_p3, %p3038_p7 }
  0xfa   : > { %p2009_p6 = pneg %p2008_p0 }
  0xfc   : > { %p2014_p4 = pnand %p2012_p11, %p2009_p6 }
  0xfe   : > { %2017 = shalt.err (!%p2014_p4)
}
  0xff   : > { %s2018_s19 = scalar_lea.vmem %s457_s5, 512  ;;  %p2026_p12 = scmp.lt.s32.totalorder %s457_s5, %s457_s5 }
 0x100   : > { %p2019_p1 = scmp.ne.s32.totalorder %s457_s5, %s2018_s19  ;;  %p2027_p2 = scmp.lt.s32.totalorder %s2018_s19, %s2018_s19 }
 0x102   : > { %p2021_p8 = pnand %p2019_p1, %p3038_p7  ;;  %p2028_p13 = por %p2027_p2, %p2026_p12 }
 0x104   : > { %p2022_p10 = pneg %p2021_p8 }
 0x106   : > { %p2029_p9 = pnand %p2028_p13, %p2022_p10 }
 0x108   : > { %2032 = shalt.err (!%p2029_p9)
}
 0x109   : > { %1685 = dma.hbm_to_vmem [thread:$0]  (!%p3039_p5), %s2971_s10, 512, %s457_s5, [#allocation21], %s3041_s9, %s3041_s9, %s3040_s26  }
 0x10a   : > { %s2033_s7 = scalar_lea.hbm %s2972_s11, 16 }
 0x10b   : > { %p2034_p3 = scmp.ne.s32.totalorder %s2972_s11, %s2033_s7  ;;  %p2040_p6 = scmp.lt.u32.totalorder %s2033_s7, %s2972_s11 }
 0x10d   : > { %p2036_p9 = pnand %p2034_p3, %p3038_p7 }
 0x10f   : > { %p2037_p0 = pneg %p2036_p9 }
 0x111   : > { %p2042_p11 = pnand %p2040_p6, %p2037_p0 }
 0x113   : > { %2045 = shalt.err (!%p2042_p11)
}
 0x114   : > { %s2046_s26 = scalar_lea.vmem %s2670_s12, 16  ;;  %s2053_s9 = scalar_lea.vmem %s2670_s12, 32 }
 0x115   : > { %p2047_p4 = scmp.ne.s32.totalorder %s2670_s12, %s2046_s26  ;;  %p2054_p10 = scmp.lt.s32.totalorder %s2670_s12, %s2670_s12 }
 0x116   : > { %p2055_p12 = scmp.lt.s32.totalorder %s2053_s9, %s2046_s26 }
 0x117   : > { %p2049_p1 = pnand %p2047_p4, %p3038_p7 }
 0x118   : > { %p2056_p2 = por %p2055_p12, %p2054_p10 }
 0x119   : > { %p2050_p8 = pneg %p2049_p1 }
 0x11b   : > { %p2057_p13 = pnand %p2056_p2, %p2050_p8 }
 0x11d   : > { %2060 = shalt.err (!%p2057_p13)
}
 0x11e   : > { %1688 = dma.hbm_to_vmem [thread:$0]  (!%p3039_p5), %s2972_s11, 16, %s2670_s12, [#allocation24]  }
 0x11f   : > { %s3042_s20 = sld [smem:[#allocation44_spill]]  ;;  %s485_s27 = scalar_lea.vmem [#allocation5], %s2571_s30 }
 0x120   : > { %s493_s15 = sshll.u32 %s485_s27, 4  ;;  %s3043_s7 = sand.u32 1, %s2257_s23   ;;  %s494_s15 = int_to_ptr.vmem [resolvable:$true] %s493_s15 }
 0x121   : > { %s482_s2 = scalar_lea.sflag [#allocation6], %s3043_s7  ;;  %p3044_p3 = scmp.ne.s32.totalorder %s3036_s24, 0 }
 0x125   : > { %s2721_s18 = scalar_lea.hbm %s3042_s20, %s2564_s17  ;;  %s2066_s1 = scalar_lea.hbm %s3042_s20, 256 }
 0x126   : > { %s2061_s25 = scalar_lea.hbm %s2721_s18, 128  ;;  %p2067_p5 = scmp.lt.u32.totalorder %s2721_s18, %s3042_s20 }
 0x127   : > { %p2062_p7 = scmp.ne.s32.totalorder %s2721_s18, %s2061_s25  ;;  %p2068_p6 = scmp.lt.u32.totalorder %s2066_s1, %s2061_s25 }
 0x128   : > { %p2070_p4 = scmp.lt.u32.totalorder %s2061_s25, %s2721_s18 }
 0x129   : > { %p2064_p9 = pnand %p2062_p7, %p3044_p3  ;;  %p2069_p11 = por %p2068_p6, %p2067_p5 }
 0x12b   : > { %p2065_p0 = pneg %p2064_p9  ;;  %p2071_p1 = por %p2070_p4, %p2069_p11 }
 0x12d   : > { %p2072_p8 = pnand %p2071_p1, %p2065_p0 }
 0x12f   : > { %2075 = shalt.err (!%p2072_p8)
}
 0x130   : > { %s2076_s5 = scalar_lea.vmem %s494_s15, 128  ;;  %s2292_s19 = smov [#allocation5]  }
 0x131   : > { %p2077_p10 = scmp.ne.s32.totalorder %s494_s15, %s2076_s5  ;;  %s2081_s13 = sshll.u32 %s2292_s19, 4  ;;  %s2082_s13 = int_to_ptr.vmem [resolvable:$false] %s2081_s13 }
 0x132   : > { %s2083_s6 = scalar_lea.vmem %s2082_s13, 256  ;;  %p2084_p13 = scmp.lt.s32.totalorder %s494_s15, %s2082_s13 }
 0x133   : > { %p2079_p12 = pnand %p2077_p10, %p3044_p3  ;;  %p2085_p7 = scmp.lt.s32.totalorder %s2083_s6, %s2076_s5 }
 0x135   : > { %p2080_p2 = pneg %p2079_p12  ;;  %p2086_p9 = por %p2085_p7, %p2084_p13 }
 0x137   : > { %p2087_p5 = pnand %p2086_p9, %p2080_p2 }
 0x139   : > { %2090 = shalt.err (!%p2087_p5)
}
 0x13a   : > { %p3045_p6 = scmp.ne.s32.totalorder %s3034_s4, 0  ;;  %s3046_s25 = sld [smem:[#allocation46_spill]] }
 0x13b   : > { %s523_s1 = scalar_lea.vmem [#allocation10], %s2571_s30 }
 0x13c   : > { %1692 = dma.hbm_to_vmem [thread:$0]  (!%p3045_p6), %s2721_s18, 128, %s494_s15, %s482_s2  }
 0x13d   : > { %s530_s26 = sshll.u32 %s523_s1, 4  ;;  %s531_s26 = int_to_ptr.vmem [resolvable:$true] %s530_s26 }
 0x140   : > { %s3047_s12 = smov %s3046_s25  ;;  %s2747_s14 = scalar_lea.hbm %s3046_s25, %s2564_s17 }
 0x141   : > { %s2091_s9 = scalar_lea.hbm %s2747_s14, 128  ;;  %s2096_s18 = scalar_lea.hbm %s3047_s12, 256 }
 0x142   : > { %p2092_p0 = scmp.ne.s32.totalorder %s2747_s14, %s2091_s9  ;;  %p2097_p1 = scmp.lt.u32.totalorder %s2747_s14, %s3047_s12 }
 0x143   : > { %p2098_p8 = scmp.lt.u32.totalorder %s2096_s18, %s2091_s9  ;;  %p2100_p12 = scmp.lt.u32.totalorder %s2091_s9, %s2747_s14 }
 0x144   : > { %p2094_p11 = pnand %p2092_p0, %p3044_p3 }
 0x145   : > { %p2099_p10 = por %p2098_p8, %p2097_p1 }
 0x146   : > { %p2095_p4 = pneg %p2094_p11 }
 0x147   : > { %p2101_p2 = por %p2100_p12, %p2099_p10 }
 0x149   : > { %p2102_p13 = pnand %p2101_p2, %p2095_p4 }
 0x14b   : > { %2105 = shalt.err (!%p2102_p13)
}
 0x14c   : > { %s2106_s13 = scalar_lea.vmem %s531_s26, 128  ;;  %s2293_s6 = smov [#allocation10]  }
 0x14d   : > { %p2107_p7 = scmp.ne.s32.totalorder %s531_s26, %s2106_s13  ;;  %s2111_s27 = sshll.u32 %s2293_s6, 4  ;;  %s2112_s27 = int_to_ptr.vmem [resolvable:$false] %s2111_s27 }
 0x14e   : > { %s2113_s7 = scalar_lea.vmem %s2112_s27, 256  ;;  %p2114_p0 = scmp.lt.s32.totalorder %s531_s26, %s2112_s27 }
 0x14f   : > { %p2109_p9 = pnand %p2107_p7, %p3044_p3  ;;  %p2115_p11 = scmp.lt.s32.totalorder %s2113_s7, %s2106_s13 }
 0x151   : > { %p2110_p5 = pneg %p2109_p9  ;;  %p2116_p6 = por %p2115_p11, %p2114_p0 }
 0x153   : > { %p2117_p1 = pnand %p2116_p6, %p2110_p5 }
 0x155   : > { %2120 = shalt.err (!%p2117_p1)
}
 0x156   : > { %p3048_p8 = scmp.ne.s32.totalorder %s3034_s4, 0  ;;  %s3049_s9 = sld [smem:[#allocation47_spill]] }
 0x157   : > { %s541_s19 = scalar_lea.vmem [#allocation11], %s2571_s30  ;;  %s3050_s15 = sand.u32 1, %s2277_s28  }
 0x158   : > { %1698 = dma.hbm_to_vmem [thread:$0]  (!%p3048_p8), %s2747_s14, 128, %s531_s26, %s2591_s3  }
 0x159   : > { %s548_s18 = sshll.u32 %s541_s19, 4  ;;  %s538_s2 = scalar_lea.sflag [#allocation12], %s3050_s15  ;;  %s549_s18 = int_to_ptr.vmem [resolvable:$true] %s548_s18 }
 0x15c   : > { %s2772_s5 = scalar_lea.hbm %s3049_s9, %s2564_s17  ;;  %s2126_s26 = scalar_lea.hbm %s3049_s9, 256 }
 0x15d   : > { %s2121_s13 = scalar_lea.hbm %s2772_s5, 128  ;;  %p2127_p12 = scmp.lt.u32.totalorder %s2772_s5, %s3049_s9 }
 0x15e   : > { %p2122_p6 = scmp.ne.s32.totalorder %s2772_s5, %s2121_s13  ;;  %p2128_p2 = scmp.lt.u32.totalorder %s2126_s26, %s2121_s13 }
 0x15f   : > { %p2130_p7 = scmp.lt.u32.totalorder %s2121_s13, %s2772_s5 }
 0x160   : > { %p2124_p4 = pnand %p2122_p6, %p3044_p3  ;;  %p2129_p13 = por %p2128_p2, %p2127_p12 }
 0x162   : > { %p2125_p10 = pneg %p2124_p4  ;;  %p2131_p9 = por %p2130_p7, %p2129_p13 }
 0x164   : > { %p2132_p5 = pnand %p2131_p9, %p2125_p10 }
 0x166   : > { %2135 = shalt.err (!%p2132_p5)
}
 0x167   : > { %s2136_s30 = scalar_lea.vmem %s549_s18, 128  ;;  %s2294_s27 = smov [#allocation11]  }
 0x168   : > { %p2137_p0 = scmp.ne.s32.totalorder %s549_s18, %s2136_s30  ;;  %s2141_s7 = sshll.u32 %s2294_s27, 4  ;;  %s2142_s7 = int_to_ptr.vmem [resolvable:$false] %s2141_s7 }
 0x169   : > { %s2143_s25 = scalar_lea.vmem %s2142_s7, 256  ;;  %p2144_p6 = scmp.lt.s32.totalorder %s549_s18, %s2142_s7 }
 0x16a   : > { %p2139_p11 = pnand %p2137_p0, %p3044_p3  ;;  %p2145_p4 = scmp.lt.s32.totalorder %s2143_s25, %s2136_s30 }
 0x16c   : > { %p2140_p1 = pneg %p2139_p11  ;;  %p2146_p8 = por %p2145_p4, %p2144_p6 }
 0x16e   : > { %p2147_p2 = pnand %p2146_p8, %p2140_p1 }
 0x170   : > { %2150 = shalt.err (!%p2147_p2)
}
 0x171   : > { %p3051_p12 = scmp.ne.s32.totalorder %s3034_s4, 0  ;;  %s3052_s1 = sld [smem:[#allocation39_spill]] }
 0x173   : > { %1701 = dma.hbm_to_vmem [thread:$0]  (!%p3051_p12), %s2772_s5, 128, %s549_s18, %s538_s2  }
 0x177   : > { %p3053_p10 = scmp.ne.s32.totalorder %s3052_s1, 0 }
 0x178   : > { %s2797_s24 = sand.u32 (!%p3053_p10), 1, %s2253_s22   ;;  %p3054_p3 = scmp.ne.s32.totalorder (!%p3053_p10), %s3028_s0, 0 }
 0x179   : > { %557 = sbr.rel (%p3053_p10) target bundleno = 1702 (0x6a6), region = 68  ;;  %s2800_s19 = sshll.u32 (!%p3053_p10), %s2797_s24, 3 }
 0x17a   : > { %s560_s15 = scalar_lea.sflag (!%p3053_p10), [#allocation6], %s2797_s24  ;;  %s563_s13 = scalar_lea.vmem (!%p3053_p10), [#allocation5], %s2800_s19 }
 0x180   : > { %2212 = dma.done.wait (%p3054_p3), %s560_s15, 128  }
 0x181   : > { %2214 = vsyncadd (%p3054_p3), %s560_s15, 4294967168  ;;  %s568_s4 = sand.u32 1, %s2405_s29   ;;  %s572_s18 = scalar_lea.vmem [#allocation8], %s2800_s19 }
 0x182   : > { %s569_s5 = scalar_lea.sflag [#allocation9], %s568_s4 }
 0x183   : > { %2216 = dma.done.wait (%p3054_p3), %s569_s5, 256  }
 0x184   : > { %2218 = vsyncadd (%p3054_p3), %s569_s5, 4294967040  ;;  %s581_s2 = scalar_lea.vmem [#allocation10], %s2800_s19  ;;  %s587_s3 = scalar_lea.sflag [#allocation12], %s568_s4 }
 0x185   : > { %s590_s14 = scalar_lea.vmem [#allocation11], %s2800_s19 }
 0x186   : > { %2220 = dma.done.wait (%p3054_p3), %s587_s3, 128  }
 0x187   : > { %2222 = vsyncadd (%p3054_p3), %s587_s3, 4294967168  ;;  %p3055_p8 = scmp.eq.s32.totalorder %s2405_s29, 0 }
 0x189   : > { %2224 = dma.done.wait (%p3055_p8), [#allocation12], 2048   ;;  %p3056_p13 = pmov %p3055_p8 }
 0x18a   : > { %p3057_p7 = pmov %p3055_p8 }
 0x18b   : > { %2226 = vsyncadd (%p3056_p13), [#allocation12], 4294965248 }
 0x18c   : > { %2228 = dma.done.wait (%p3057_p7), [#allocation15], 2112   ;;  %p3058_p9 = pmov %p3057_p7 }
 0x18d   : > { %p3059_p5 = pmov %p3057_p7 }
 0x18e   : > { %2230 = vsyncadd (%p3058_p9), [#allocation15], 4294965184 }
 0x18f   : > { %2232 = dma.done.wait (%p3059_p5), [#allocation18], 2112   ;;  %p3060_p0 = pmov %p3059_p5 }
 0x191   : > { %2234 = vsyncadd (%p3060_p0), [#allocation18], 4294965184  ;;  %p3061_p11 = pmov %p3060_p0 }
 0x192   : > { %p3062_p1 = pmov %p3060_p0 }
 0x193   : > { %2236 = dma.done.wait (%p3061_p11), [#allocation21], 576  }
 0x194   : > { %2238 = vsyncadd (%p3062_p1), [#allocation21], 4294966720  ;;  %p3063_p6 = pmov %p3060_p0 }
 0x195   : > { %p3064_p4 = pmov %p3060_p0 }
 0x196   : > { %2240 = dma.done.wait (%p3063_p6), [#allocation24], 16  }
 0x197   : > { %2242 = vsyncadd (%p3064_p4), [#allocation24], 4294967280  ;;  %s3065_s0 = sld [smem:[#allocation35_spill]]  ;;  %v2295_v0 = vmov 0.0|0.0   ;;  %vm2296_vm0 = vmmov 0   ;;  %v2297_v1 = vmov 0.0  }
 0x198   : > { %1604 = vmatprep.subr.bf16.mxu0 %v2295_v0  ;;  %1610 = vmatprep.subr.bf16.mxu1 %v2295_v0  ;;  %v682_v14 = vld [vmem:[%s581_s2] sm:$0xff]  ;;  %vm698_vm1 = vcmask 261120   ;;  %v683_v15 = vld [vmem:[%s590_s14] sm:$0xff]  ;;  %vm860_vm2 = vcmask 64512   ;;  %s677_s1 = scalar_lea.vmem [#allocation25], %s2800_s19 }
 0x199   : > { %1564 = vmatprep.mubr.msk.f32.mxu0 %vm2296_vm0, %v2297_v1  ;;  %1575 = vmatprep.mubr.msk.f32.mxu1 %vm2296_vm0, %v2297_v1 }
 0x19d   : > { %s2843_s26 = sshll.u32 %s3065_s0, 5  ;;  %s2860_s6 = sshll.u32 %s3065_s0, 3 }
 0x19e   : > { %s685_s29 = scalar_lea.vmem [#allocation16], %s2843_s26  ;;  %s772_s17 = scalar_lea.vmem [#allocation19], %s2843_s26 }
 0x19f   : > { %v686_v2 = vld [vmem:[%s685_s29] sm:$0xff]  ;;  %v687_v3 = vld [vmem:[%s685_s29 + $0x8] sm:$0xff]  ;;  %v688_v7 = vld [vmem:[%s685_s29 + $0x10] sm:$0xff]  ;;  %s690_s30 = scalar_lea.vmem [#allocation17], %s3065_s0  ;;  %s777_s27 = scalar_lea.vmem [#allocation20], %s3065_s0 }
 0x1a0   : > { %v773_v4 = vld [vmem:[%s772_s17] sm:$0xff]  ;;  %v1605_v5 = vpack.c.bf16 %v687_v3, %v686_v2  ;;  %v774_v6 = vld [vmem:[%s772_s17 + $0x8] sm:$0xff]  ;;  %v689_v8 = vld [vmem:[%s685_s29 + $0x18] sm:$0xff]  ;;  %s859_s7 = scalar_lea.vmem [#allocation2], %s2860_s6  ;;  %s862_s25 = scalar_lea.vmem [#allocation3], %s2860_s6 }
 0x1a1   : > { %v1611_v9 = vpack.c.bf16 %v774_v6, %v773_v4  ;;  %v775_v10 = vld [vmem:[%s772_s17 + $0x10] sm:$0xff]  ;;  %v776_v11 = vld [vmem:[%s772_s17 + $0x18] sm:$0xff]  ;;  %v1608_v12 = vpack.c.bf16 %v689_v8, %v688_v7  ;;  %v1515_v16 = vld [vmem:[%s690_s30] ss:$0 sm:$0xff]  ;;  %p1520_p2 = scmp.ne.s32.totalorder %s3065_s0, 0 }
 0x1a2   : > { %1606 = vmatpush3.bf16.msra.mxu0 %v1605_v5  ;;  %v1614_v13 = vpack.c.bf16 %v776_v11, %v775_v10  ;;  %v1517_v17 = vld [vmem:[%s777_s27] ss:$0 sm:$0xff]  ;;  %v1521_v24 = vld [vmem:[#allocation23] ss:$0 sm:$0xff] (!%p1520_p2) }
 0x1a3   : > { %1612 = vmatpush3.bf16.msra.mxu1 %v1611_v9  ;;  %1607 = vmatprep.subr.bf16.mxu0 %v2295_v0  ;;  %876 = vst.msk [vmem:[#allocation4] sm:$0xff] (!%p1520_p2), %vm698_vm1, %v1521_v24 }
 0x1a4   : > { %1613 = vmatprep.subr.bf16.mxu1 %v2295_v0 }
 0x1a6   : > { %1609 = vmatpush3.bf16.msra.mxu0 %v1608_v12 }
 0x1a7   : > { %1615 = vmatpush3.bf16.msra.mxu1 %v1614_v13 }
 0x1a9   : > { %1565 = vmatmul.mubr.msk.f32.vlgmr.msra.gmra.mrb[0].mxu0 %vm698_vm1, %v682_v14 }
 0x1aa   : > { %1576 = vmatmul.mubr.msk.f32.vlgmr.msra.gmra.mrb[0].mxu1 %vm698_vm1, %v683_v15 }
 0x27a   : > { %867 = sbr.rel (%p1520_p2) target bundleno = 641 (0x281), region = 124 }
 0x27c   : > { %v768_v18 = vpop.f32.mrb[0].mxu0 }
 0x27d   : > { %v769_v19 = vadd.f32 %v1515_v16, %v768_v18  ;;  %v854_v20 = vpop.f32.mrb[0].mxu1  ;;  %v1566_v21 = vpop.f32.mrb[1].mxu0 }
 0x27e   : > { %v855_v22 = vadd.f32 %v1517_v17, %v854_v20  ;;  %v1577_v23 = vpop.f32.mrb[1].mxu1 }
 0x27f   : > { %861 = vst.msk [vmem:[%s859_s7] sm:$0xff] %vm860_vm2, %v769_v19 }
 0x280   : > { %863 = vst.msk [vmem:[%s862_s25] sm:$0xff] %vm860_vm2, %v855_v22 }
 0x281 PF: > { %1616 = vmatprep.subr.bf16.mxu0 %v2295_v0  ;;  %1586 = vmatprep.mubr.msk.f32.mxu0 %vm2296_vm0, %v2297_v1  ;;  %s879_s15 = scalar_lea.vmem [#allocation13], %s2843_s26  ;;  %s3066_s4 = sld [smem:[#allocation35_spill]]  ;;  %v877_v31 = vld [vmem:[%s572_s18] sm:$0xff]  ;;  %v969_v37 = vld [vmem:[%s563_s13] sm:$0xff] }
 0x282   : > { %v880_v25 = vld [vmem:[%s879_s15] sm:$0xff]  ;;  %v881_v26 = vld [vmem:[%s879_s15 + $0x8] sm:$0xff]  ;;  %v882_v27 = vld [vmem:[%s879_s15 + $0x10] sm:$0xff]  ;;  %1589 = vmatprep.subr.mxu1 %v2297_v1  ;;  %1591 = vmatprep.mubr.msk.f32.mxu1 %vm2296_vm0, %v2297_v1  ;;  %s1134_s13 = scalar_lea.vmem [#allocation22], %s2860_s6 }
 0x283   : > { %v1617_v28 = vpack.c.bf16 %v881_v26, %v880_v25  ;;  %v883_v29 = vld [vmem:[%s879_s15 + $0x18] sm:$0xff]  ;;  %v1135_v48 = vld [vmem:[%s1134_s13] sm:$0xff] }
 0x284   : > { %v1620_v30 = vpack.c.bf16 %v883_v29, %v882_v27  ;;  %v1133_v54 = vld [vmem:[#allocation4] sm:$0xff] }
 0x285   : > { %1618 = vmatpush3.bf16.msra.mxu0 %v1617_v28 }
 0x286   : > { %1619 = vmatprep.subr.bf16.mxu0 %v2295_v0  ;;  %v968_v32 = vld [vmem:[%s859_s7] sm:$0xff] }
 0x287   : > { %1590 = vmatpush3.xpose.msk.msra.mxu1 %vm860_vm2, %v968_v32  ;;  %s884_s5 = scalar_lea.vmem [#allocation14], %s3066_s4  ;;  %v1057_v42 = vld [vmem:[%s862_s25] sm:$0xff]  ;;  %p1530_p12 = scmp.ne.s32.totalorder %s3066_s4, 3 }
 0x288   : > { %1594 = vmatprep.subr.mxu1 %v2297_v1  ;;  %v1523_v33 = vld [vmem:[%s884_s5] ss:$0 sm:$0xff] }
 0x289   : > { %1621 = vmatpush3.bf16.msra.mxu0 %v1620_v30 }
 0x28a   : > { %1599 = vmatprep.subr.mxu0 %v2297_v1 }
 0x28c   : > { %1587 = vmatmul.mubr.msk.f32.vlgmr.msra.gmra.mrb[2].mxu0 %vm698_vm1, %v877_v31 }
 0x28d   : > { %1601 = vmatprep.mubr.msk.f32.mxu0 %vm2296_vm0, %v2297_v1  ;;  %1600 = vmatpush3.msra.mxu0 %v1135_v48 }
 0x35f   : > { %v962_v34 = vpop.f32.mrb[2].mxu0 }
 0x360   : > { %v963_v35 = vadd.f32 %v1523_v33, %v962_v34  ;;  %v1588_v36 = vpop.f32.mrb[3].mxu0 }
 0x362   : > { %1592 = vmatmul.mubr.msk.f32.vlgmr.msra.gmra.mrb[2].mxu1 %vm860_vm2, %v963_v35 }
 0x363   : > { %1596 = vmatprep.mubr.msk.f32.mxu1 %vm2296_vm0, %v2297_v1  ;;  %1595 = vmatpush3.msra.mxu1 %v1057_v42 }
 0x435   : > { %v1043_v38 = vpop.f32.mrb[2].mxu1 }
 0x436   : > { %v1044_v39 = vadd.f32 %v1043_v38, %v969_v37  ;;  %v1593_v40 = vpop.f32.mrb[3].mxu1 }
 0x438   : > { %v1047_v41 = vsel %vm860_vm2, %v1044_v39, -inf }
 0x439   : > { %1048 = vmax.xlane.f32.xlu0 %v1047_v41 }
 0x4c6   : > { %v1049_v43 = vpop.xlane.xlu0 %1048 }
 0x4c7   : > { %v1050_v44 = vsub.f32 %v1044_v39, %v1049_v43 }
 0x4c9   : > { %v1051_v45 = vmul.f32 1.442695, %v1050_v44 }
 0x4cb   : > { %1803 = vpow2.f32 %v1051_v45 }
 0x4d5   : > { %v1804_v46 = vpop.eup %1803 }
 0x4d6   : > { %1597 = vmatmul.mubr.msk.f32.vlgmr.msra.gmra.mrb[4].mxu1 %vm860_vm2, %v1804_v46  ;;  %v1053_v47 = vsel %vm860_vm2, %v1804_v46, 0.0 }
 0x4d7   : > { %1054 = vadd.xlane.f32.xlu0 %v1053_v47 }
 0x564   : > { %v1055_v49 = vpop.xlane.xlu0 %1054 }
 0x565   : > { %1805 = vrcp.f32 %v1055_v49 }
 0x56f   : > { %v1806_v50 = vpop.eup %1805 }
 0x5a9   : > { %v1127_v51 = vpop.f32.mrb[4].mxu1 }
 0x5aa   : > { %v1132_v52 = vmul.f32 %v1806_v50, %v1127_v51  ;;  %v1598_v53 = vpop.f32.mrb[5].mxu1 }
 0x5ac   : > { %1602 = vmatmul.mubr.msk.f32.vlgmr.msra.gmra.mrb[4].mxu0 %vm860_vm2, %v1132_v52 }
 0x67c   : > { %1214 = sbr.rel (%p1530_p12) target bundleno = 1675 (0x68b), region = 128 }
 0x67f   : > { %v1205_v55 = vpop.f32.mrb[4].mxu0 }
 0x680   : > { %v1209_v56 = vadd.f32 %v1205_v55, %v1133_v54  ;;  %v1603_v57 = vpop.f32.mrb[5].mxu0 }
 0x682   : > { %1210 = vst.msk [vmem:[#allocation4] sm:$0xff] %vm698_vm1, %v1209_v56 }
 0x689   : > { %v1215_v58 = vld [vmem:[#allocation4] sm:$0xff] }
 0x68a   : > { %1216 = vst.msk [vmem:[%s677_s1] sm:$0xff] %vm698_vm1, %v1215_v58 }
 0x68b PF: > { %s3067_s18 = sld [smem:[#allocation36_spill]]  ;;  %s3068_s0 = sld [smem:[#allocation53_spill]] }
 0x68c   : > { %s1232_s29 = sshll.u32 %s677_s1, 4  ;;  %s1218_s17 = scalar_lea.sflag [#allocation7], %s2797_s24  ;;  %s1233_s29 = int_to_ptr.vmem [resolvable:$true] %s1232_s29 }
 0x68d   : > { %s2151_s6 = scalar_lea.vmem %s1233_s29, 128  ;;  %p3069_p3 = scmp.ne.s32.totalorder %s3030_s16, 0 }
 0x68e   : > { %p2152_p10 = scmp.ne.s32.totalorder %s1233_s29, %s2151_s6  ;;  %s2298_s30 = smov [#allocation25]  }
 0x68f   : > { %s2155_s27 = sshll.u32 %s2298_s30, 4  ;;  %s2156_s27 = int_to_ptr.vmem [resolvable:$false] %s2155_s27 }
 0x690   : > { %p2153_p8 = pnand %p2152_p10, %p3069_p3  ;;  %s2157_s7 = scalar_lea.vmem %s2156_s27, 256 }
 0x691   : > { %s1532_s2 = sshll.u32 %s3067_s18, 7  ;;  %p2158_p7 = scmp.lt.s32.totalorder %s1233_s29, %s2156_s27 }
 0x692   : > { %s2911_s26 = scalar_lea.hbm %s3068_s0, %s1532_s2  ;;  %p2154_p13 = pneg %p2153_p8 }
 0x693   : > { %p2159_p9 = scmp.lt.s32.totalorder %s2157_s7, %s2151_s6 }
 0x695   : > { %p2160_p5 = por %p2159_p9, %p2158_p7 }
 0x697   : > { %p2161_p0 = pnand %p2160_p5, %p2154_p13 }
 0x699   : > { %2164 = shalt.err (!%p2161_p0)
}
 0x69a   : > { %s2165_s24 = scalar_lea.hbm %s2911_s26, 128  ;;  %s2169_s1 = scalar_lea.hbm %s3068_s0, 256 }
 0x69b   : > { %p2166_p11 = scmp.ne.s32.totalorder %s2911_s26, %s2165_s24  ;;  %p2170_p4 = scmp.lt.u32.totalorder %s2911_s26, %s3068_s0 }
 0x69c   : > { %p2171_p2 = scmp.lt.u32.totalorder %s2169_s1, %s2165_s24  ;;  %p2173_p10 = scmp.lt.u32.totalorder %s2165_s24, %s2911_s26 }
 0x69d   : > { %p2167_p1 = pnand %p2166_p11, %p3069_p3 }
 0x69e   : > { %p2172_p12 = por %p2171_p2, %p2170_p4 }
 0x69f   : > { %p2168_p6 = pneg %p2167_p1 }
 0x6a0   : > { %p2174_p8 = por %p2173_p10, %p2172_p12 }
 0x6a2   : > { %p2175_p13 = pnand %p2174_p8, %p2168_p6 }
 0x6a4   : > { %2178 = shalt.err (!%p2175_p13)
}
 0x6a5   : > { %1662 = dma.vmem_to_hbm [thread:$0]  (%p3069_p3), %s1233_s29, 128, %s2911_s26, %s1218_s17  }
 0x6a6 PF: > { %s3070_s5 = sld [smem:[#allocation42_spill]]  ;;  %p1723_p7 = scmp.ge.s32.totalorder %s2277_s28, 2 }
 0x6a7   : > { %s1244_s13 = sand.u32 1, %s2249_s21  }
 0x6a8   : > { %s1245_s18 = scalar_lea.sflag [#allocation7], %s1244_s13 }
 0x6ac   : > { %p3071_p9 = scmp.ne.s32.totalorder %s3070_s5, 0 }
 0x6ae   : > { %p1703_p5 = pnand %p1723_p7, %p3071_p9 }
 0x6b0   : > { %2244 = dma.done.wait (!%p1703_p5), %s1245_s18, 128  }
 0x6b1   : > { %2246 = vsyncadd (!%p1703_p5), %s1245_s18, 4294967168  ;;  %s38_s28 = sadd.s32 1, %s2277_s28   ;;  %s3072_s2 = sld [smem:[#allocation43_spill]] }
 0x6b2   : > { %p35_p0 = scmp.ge.s32.totalorder %s38_s28, 10   ;;  %s3073_s24 = sld [smem:[#allocation37_spill]] }
 0x6b3   : > { %s3074_s25 = sld [smem:[#allocation38_spill]]  ;;  %s3075_s26 = sld [smem:[#allocation40_spill]] }
 0x6b4   : > { %s3076_s27 = sld [smem:[#allocation41_spill]]  ;;  %s3077_s21 = smov %s2253_s22 }
 0x6b5   : > { %s3078_s22 = smov %s2257_s23  ;;  %37 = sbr.rel (!%p35_p0) target bundleno = 26 (0x1a), region = 205 }
 0x6b7   : > { %s3079_s23 = smov %s3072_s2 }
 0x6bc   :  { %1250 = vsyncpa [#allocation6], 1 }
 0x6bd   :  { %1252 = vsyncpa [#allocation6 + $0x1], 1 }
 0x6be   :  { %1253 = vsyncpa [#allocation9], 1 }
 0x6bf   :  { %1255 = vsyncpa [#allocation9 + $0x1], 1 }
 0x6c0   :  { %1256 = vsyncpa [#allocation12], 1 }
 0x6c1   :  { %1258 = vsyncpa [#allocation12 + $0x1], 1 }
 0x6c2   :  { %1259 = vsyncpa [#allocation15], 1 }
 0x6c3   :  { %1260 = vsyncpa [#allocation18], 1 }
 0x6c4   :  { %1261 = vsyncpa [#allocation21], 1 }
 0x6c5   :  { %1262 = vsyncpa [#allocation24], 1 }
 0x6c6   :  { %1263 = vsyncpa [#allocation7], 1 }
 0x6c7   :  { %1265 = vsyncpa [#allocation7 + $0x1], 1 }

</bundles_post_ra>
